<compile_context>
chip_gen: v5e
topology: v5e:2x2
jax: 0.10.0
libtpu: 0.0.40
codegen_flags: <defaults>
</compile_context>

<pallas_src>
import math

import jax
import jax.numpy as jnp
from jax.experimental import pallas as pl
from jax.experimental.pallas import tpu as pltpu

ALPHA = 1.0 / 2.0 * math.pi  # python precedence: (1/2) * pi = pi/2, matches the module


def _choose_tiles(B, F):
    # Batch tile: multiple of 8 (sublanes), capped; tiny batches use full extent.
    if B % 8 == 0:
        TB = min(B, 512)
    elif B > 8:
        TB = min((B // 8) * 8, 512)       # partial last tile handled by masking
    else:
        TB = B                            # B < 8: full extent (allowed)
    # Feature tile: multiple of 128 (lanes), capped; tiny F uses full extent.
    if F % 128 == 0:
        TF = min(F, 1024)
    elif F > 128:
        TF = min((F // 128) * 128, 1024)  # partial last tile handled by masking
    else:
        TF = F                            # F < 128: full extent (allowed)
    return TB, TF


def _make_kernel(B, F, TB, TF, nf):
    row_mask_needed = (B % TB) != 0
    col_mask_needed = (F % TF) != 0
    tb_aligned = (TB % 8) == 0

    def kernel(feat_ref, y_ref, gexp_ref, abias_ref, gauss_ref, part_ref,
               col_ref, acc_ref):
        i = pl.program_id(0)              # B tile index (megacore-parallel)
        j = pl.program_id(1)              # F tile index (sequential)

        @pl.when(j == 0)
        def _per_btile_setup():
            # Hoisted per-row Gaussian factor: exp(-0.5*||y_b||^2), once per B tile.
            y = y_ref[...].astype(jnp.float32)                           # (TB, L)
            col_ref[...] = jnp.exp(-0.5 * jnp.sum(y * y, axis=1, keepdims=True))
            acc_ref[...] = jnp.zeros_like(acc_ref)

        gexp = gexp_ref[j]                 # (1, TF)  VMEM-resident exp(-0.5*lin^2)
        abias = abias_ref[j]               # (1, TF)  VMEM-resident alpha*bias

        # Factored Gaussian: exp(-0.5*(||y||^2 + lin^2)) = col * gexp  (pure VPU).
        gauss = col_ref[...] * gexp                                      # (TB, TF)
        gauss_ref[...] = gauss.astype(gauss_ref.dtype)

        feat = feat_ref[...].astype(jnp.float32)                         # (TB, TF)
        diff = jnp.float32(ALPHA) * feat + abias - gauss
        sq = diff * diff

        if row_mask_needed or col_mask_needed:
            ok = None
            if row_mask_needed:
                rows = jax.lax.broadcasted_iota(jnp.int32, (TB, TF), 0) + i * TB
                ok = rows < B
            if col_mask_needed:
                cols = jax.lax.broadcasted_iota(jnp.int32, (TB, TF), 1) + j * TF
                cm = cols < F
                ok = cm if ok is None else jnp.logical_and(ok, cm)
            sq = jnp.where(ok, sq, 0.0)

        # VALU-only partial reduce into a small (8, TF) accumulator.
        if tb_aligned:
            acc_ref[...] += sq.reshape(TB // 8, 8, TF).sum(axis=0)
        else:
            acc_ref[...] += sq             # tiny B (<8): accumulator is (TB, TF)

        @pl.when(j == nf - 1)
        def _emit_partial():
            # One XLU reduce per B tile; lane-dense partial-loss write.
            s = jnp.sum(acc_ref[...])
            lane = jax.lax.broadcasted_iota(jnp.int32, (1, 1, 128), 2)
            part_ref[...] = jnp.where(lane == 0, s, jnp.float32(0.0))

    return kernel


def gaussian_approximation_forward(batch_feat, batch_y, bias, edge=1.0,
                                   tile_override=None):
    """Returns (loss, gaussian_feat) matching the PyTorch module's forward."""
    B, F = batch_feat.shape
    batch_y = batch_y.reshape(B, -1)                  # labels.view(-1, label_size)
    L = batch_y.shape[1]

    TB, TF = tile_override if tile_override is not None else _choose_tiles(B, F)
    nb, nf = pl.cdiv(B, TB), pl.cdiv(F, TF)
    F_pad = nf * TF

    # Tiny per-feature constants, padded to the tile grid and kept VMEM-resident.
    lin = jnp.linspace(-edge, edge, F, dtype=jnp.float32)
    gexp = jnp.exp(-0.5 * lin * lin)                                  # exp(-0.5*lin^2)
    abias = jnp.float32(ALPHA) * bias.astype(jnp.float32)             # alpha * bias
    if F_pad != F:
        gexp = jnp.pad(gexp, (0, F_pad - F))
        abias = jnp.pad(abias, (0, F_pad - F))
    gexp = gexp.reshape(nf, 1, TF)
    abias = abias.reshape(nf, 1, TF)

    kernel = _make_kernel(B, F, TB, TF, nf)
    acc_rows = 8 if TB % 8 == 0 else TB

    gauss, partials = pl.pallas_call(
        kernel,
        out_shape=(
            jax.ShapeDtypeStruct((B, F), jnp.float32),        # gaussian_feat
            jax.ShapeDtypeStruct((nb, 1, 128), jnp.float32),  # per-B-tile loss partials
        ),
        grid_spec=pltpu.PrefetchScalarGridSpec(
            num_scalar_prefetch=0,
            grid=(nb, nf),
            in_specs=[
                pl.BlockSpec((TB, TF), lambda i, j: (i, j)),        # batch_feat
                pl.BlockSpec((TB, L), lambda i, j: (i, 0)),         # batch_y (1 DMA/B-tile)
                pl.BlockSpec((nf, 1, TF), lambda i, j: (0, 0, 0)),  # gexp (resident)
                pl.BlockSpec((nf, 1, TF), lambda i, j: (0, 0, 0)),  # alpha*bias (resident)
            ],
            out_specs=(
                pl.BlockSpec((TB, TF), lambda i, j: (i, j)),        # gaussian_feat
                pl.BlockSpec((1, 1, 128), lambda i, j: (i, 0, 0)),  # loss partials
            ),
            scratch_shapes=[
                pltpu.VMEM((TB, 1), jnp.float32),          # col = exp(-0.5*||y||^2)
                pltpu.VMEM((acc_rows, TF), jnp.float32),   # VALU loss accumulator
            ],
        ),
        compiler_params=pltpu.CompilerParams(
            # B axis carries no cross-tile state -> megacore-parallel on v7x;
            # F axis carries the per-B-tile accumulator -> sequential.
            dimension_semantics=("parallel", "arbitrary"),
            vmem_limit_bytes=32 * 1024 * 1024,
        ),
    )(batch_feat, batch_y, gexp, abias)

    loss = jnp.sum(partials) * jnp.float32(1.0 / (B * F))   # nn.MSELoss mean reduction
    return loss, gauss


def _reference(batch_feat, batch_y, bias, edge=1.0):
    B, F = batch_feat.shape
    y = batch_y.reshape(B, -1).astype(jnp.float32)
    lin = jnp.linspace(-edge, edge, F, dtype=jnp.float32)
    gauss = jnp.exp(-0.5 * (jnp.sum(y * y, axis=1, keepdims=True) + lin[None, :] ** 2))
    feat = batch_feat.astype(jnp.float32) + bias[None, :].astype(jnp.float32)
    loss = jnp.mean((ALPHA * feat - gauss) ** 2)
    return loss, gauss


if __name__ == "__main__":
    key = jax.random.PRNGKey(0)

    def run_case(B, F, L, tile_override=None):
        k1, k2 = jax.random.split(jax.random.fold_in(key, B * 1000 + F))
        batch_feat = jax.random.normal(k1, (B, F), dtype=jnp.float32)
        batch_y = jax.random.normal(k2, (B, L), dtype=jnp.float32)
        bias = 0.6 * jnp.ones((F,), dtype=jnp.float32)   # __init__ (need_bias=True)

        loss, gauss = gaussian_approximation_forward(
            batch_feat, batch_y, bias, tile_override=tile_override)
        jax.block_until_ready((loss, gauss))

        ref_loss, ref_gauss = _reference(batch_feat, batch_y, bias)
        assert jnp.allclose(gauss, ref_gauss, atol=1e-5, rtol=1e-5)
        assert jnp.allclose(loss, ref_loss, atol=1e-5, rtol=1e-5)

    # Small aligned shapes: batch=8, feat_size=256, label_size=4 (single tile).
    run_case(8, 256, 4)
    # Multi-step grid with row+col edge masking: batch=20, feat_size=200.
    run_case(20, 200, 3, tile_override=(8, 128))
    # Same shape, auto-chosen tiles (TB=16, TF=128) -> partial tiles on both axes.
    run_case(20, 200, 3)
    # Tiny unaligned shapes (B<8, F<128): full-extent fallback path.
    run_case(4, 96, 2)

    print("KERNEL_OK")
</pallas_src>

<mosaic_0001>
module attributes {stable_mosaic.version = 11 : i64} {
  func.func @kernel(%arg0: i32, %arg1: i32, %arg2: memref<8x256xf32, #tpu.memory_space<vmem>>, %arg3: memref<8x4xf32, #tpu.memory_space<vmem>>, %arg4: memref<1x1x256xf32, #tpu.memory_space<vmem>>, %arg5: memref<1x1x256xf32, #tpu.memory_space<vmem>>, %arg6: memref<8x256xf32, #tpu.memory_space<vmem>>, %arg7: memref<1x1x128xf32, #tpu.memory_space<vmem>>, %arg8: memref<8x1xf32, #tpu.memory_space<vmem>>, %arg9: memref<8x256xf32, #tpu.memory_space<vmem>>) attributes {dimension_semantics = [#tpu.dimension_semantics<parallel>, #tpu.dimension_semantics<arbitrary>], iteration_bounds = array<i64: 1, 1>, scalar_prefetch = 0 : i64, scratch_operands = 2 : i64, tpu.core_type = #tpu.core_type<tc>, window_params = [{transform_indices = @transform_0, window_bounds = array<i64: 8, 256>}, {transform_indices = @transform_1, window_bounds = array<i64: 8, 4>}, {pipeline_mode = #tpu.pipeline_mode<synchronous>, transform_indices = @transform_2, window_bounds = array<i64: 1, 1, 256>}, {pipeline_mode = #tpu.pipeline_mode<synchronous>, transform_indices = @transform_3, window_bounds = array<i64: 1, 1, 256>}, {transform_indices = @transform_4, window_bounds = array<i64: 8, 256>}, {transform_indices = @transform_5, window_bounds = array<i64: 1, 1, 128>}]} {
    %c0_i32 = arith.constant 0 : i32
    %0 = arith.cmpi eq, %arg1, %c0_i32 : i32
    %1 = arith.extui %0 : i1 to i32
    %c0_i32_0 = arith.constant 0 : i32
    %2 = arith.cmpi ne, %1, %c0_i32_0 : i32
    scf.if %2 {
      %c0_17 = arith.constant 0 : index
      %c0_18 = arith.constant 0 : index
      %29 = vector.load %arg3[%c0_17, %c0_18] : memref<8x4xf32, #tpu.memory_space<vmem>>, vector<8x4xf32>
      %30 = arith.mulf %29, %29 : vector<8x4xf32>
      %cst_19 = arith.constant dense<0.000000e+00> : vector<8xf32>
      %31 = vector.multi_reduction <add>, %30, %cst_19 [1] : vector<8x4xf32> to vector<8xf32>
      %32 = vector.shape_cast %31 : vector<8xf32> to vector<8x1xf32>
      %cst_20 = arith.constant -5.000000e-01 : f32
      %33 = vector.broadcast %cst_20 : f32 to vector<8x1xf32>
      %34 = arith.mulf %33, %32 : vector<8x1xf32>
      %35 = math.exp %34 : vector<8x1xf32>
      %c0_21 = arith.constant 0 : index
      %c0_22 = arith.constant 0 : index
      %36 = vector.load %arg8[%c0_21, %c0_22] : memref<8x1xf32, #tpu.memory_space<vmem>>, vector<8x1xf32>
      tpu.vector_store %arg8[%c0_21, %c0_22], %35 {strides = array<i32>} : memref<8x1xf32, #tpu.memory_space<vmem>>, vector<8x1xf32>,
      %cst_23 = arith.constant 0.000000e+00 : f32
      %37 = vector.broadcast %cst_23 : f32 to vector<8x256xf32>
      %c0_24 = arith.constant 0 : index
      %c0_25 = arith.constant 0 : index
      %38 = vector.load %arg9[%c0_24, %c0_25] : memref<8x256xf32, #tpu.memory_space<vmem>>, vector<8x256xf32>
      tpu.vector_store %arg9[%c0_24, %c0_25], %37 {strides = array<i32>} : memref<8x256xf32, #tpu.memory_space<vmem>>, vector<8x256xf32>,
    } else {
    }
    %3 = arith.index_cast %arg1 : i32 to index
    %c0 = arith.constant 0 : index
    %c0_1 = arith.constant 0 : index
    %4 = vector.load %arg4[%3, %c0, %c0_1] : memref<1x1x256xf32, #tpu.memory_space<vmem>>, vector<1x1x256xf32>
    %5 = vector.shape_cast %4 : vector<1x1x256xf32> to vector<1x256xf32>
    %6 = arith.index_cast %arg1 : i32 to index
    %c0_2 = arith.constant 0 : index
    %c0_3 = arith.constant 0 : index
    %7 = vector.load %arg5[%6, %c0_2, %c0_3] : memref<1x1x256xf32, #tpu.memory_space<vmem>>, vector<1x1x256xf32>
    %8 = vector.shape_cast %7 : vector<1x1x256xf32> to vector<1x256xf32>
    %c0_4 = arith.constant 0 : index
    %c0_5 = arith.constant 0 : index
    %9 = vector.load %arg8[%c0_4, %c0_5] : memref<8x1xf32, #tpu.memory_space<vmem>>, vector<8x1xf32>
    %10 = vector.broadcast %9 : vector<8x1xf32> to vector<8x256xf32>
    %11 = vector.broadcast %5 : vector<1x256xf32> to vector<8x256xf32>
    %12 = arith.mulf %10, %11 : vector<8x256xf32>
    %c0_6 = arith.constant 0 : index
    %c0_7 = arith.constant 0 : index
    %13 = vector.load %arg6[%c0_6, %c0_7] : memref<8x256xf32, #tpu.memory_space<vmem>>, vector<8x256xf32>
    tpu.vector_store %arg6[%c0_6, %c0_7], %12 {strides = array<i32>} : memref<8x256xf32, #tpu.memory_space<vmem>>, vector<8x256xf32>,
    %c0_8 = arith.constant 0 : index
    %c0_9 = arith.constant 0 : index
    %14 = vector.load %arg2[%c0_8, %c0_9] : memref<8x256xf32, #tpu.memory_space<vmem>>, vector<8x256xf32>
    %cst = arith.constant 1.57079637 : f32
    %15 = vector.broadcast %cst : f32 to vector<8x256xf32>
    %16 = arith.mulf %15, %14 : vector<8x256xf32>
    %17 = vector.broadcast %8 : vector<1x256xf32> to vector<8x256xf32>
    %18 = arith.addf %16, %17 : vector<8x256xf32>
    %19 = arith.subf %18, %12 : vector<8x256xf32>
    %20 = arith.mulf %19, %19 : vector<8x256xf32>
    %c0_10 = arith.constant 0 : index
    %c0_11 = arith.constant 0 : index
    %21 = vector.load %arg9[%c0_10, %c0_11] : memref<8x256xf32, #tpu.memory_space<vmem>>, vector<8x256xf32>
    %22 = vector.shape_cast %20 : vector<8x256xf32> to vector<1x8x256xf32>
    %cst_12 = arith.constant dense<0.000000e+00> : vector<8x256xf32>
    %23 = vector.multi_reduction <add>, %22, %cst_12 [0] : vector<1x8x256xf32> to vector<8x256xf32>
    %24 = arith.addf %21, %23 : vector<8x256xf32>
    %c0_13 = arith.constant 0 : index
    %c0_14 = arith.constant 0 : index
    %25 = vector.load %arg9[%c0_13, %c0_14] : memref<8x256xf32, #tpu.memory_space<vmem>>, vector<8x256xf32>
    tpu.vector_store %arg9[%c0_13, %c0_14], %24 {strides = array<i32>} : memref<8x256xf32, #tpu.memory_space<vmem>>, vector<8x256xf32>,
    %c0_i32_15 = arith.constant 0 : i32
    %26 = arith.cmpi eq, %arg1, %c0_i32_15 : i32
    %27 = arith.extui %26 : i1 to i32
    %c0_i32_16 = arith.constant 0 : i32
    %28 = arith.cmpi ne, %27, %c0_i32_16 : i32
    scf.if %28 {
      %c0_17 = arith.constant 0 : index
      %c0_18 = arith.constant 0 : index
      %29 = vector.load %arg9[%c0_17, %c0_18] : memref<8x256xf32, #tpu.memory_space<vmem>>, vector<8x256xf32>
      %30 = vector.shape_cast %29 : vector<8x256xf32> to vector<1x8x256xf32>
      %cst_19 = arith.constant dense<0.000000e+00> : vector<1xf32>
      %31 = vector.multi_reduction <add>, %30, %cst_19 [1, 2] : vector<1x8x256xf32> to vector<1xf32>
      %32 = vector.shape_cast %31 : vector<1xf32> to vector<1x1x1xf32>
      %33 = vector.extract %32[0, 0, 0] : f32 from vector<1x1x1xf32>
      %34 = tpu.iota {dimensions = array<i32: 2>} : vector<1x1x128xi32>
      %c0_i32_20 = arith.constant 0 : i32
      %35 = vector.broadcast %c0_i32_20 : i32 to vector<1x1x128xi32>
      %36 = arith.cmpi eq, %34, %35 : vector<1x1x128xi32>
      %cst_21 = arith.constant 0.000000e+00 : f32
      %37 = vector.broadcast %33 : f32 to vector<1x1x128xf32>
      %38 = vector.broadcast %cst_21 : f32 to vector<1x1x128xf32>
      %39 = arith.select %36, %37, %38 : vector<1x1x128xi1>, vector<1x1x128xf32>
      %c0_22 = arith.constant 0 : index
      %c0_23 = arith.constant 0 : index
      %c0_24 = arith.constant 0 : index
      %40 = vector.load %arg7[%c0_22, %c0_23, %c0_24] : memref<1x1x128xf32, #tpu.memory_space<vmem>>, vector<1x1x128xf32>
      tpu.vector_store %arg7[%c0_22, %c0_23, %c0_24], %39 {strides = array<i32>} : memref<1x1x128xf32, #tpu.memory_space<vmem>>, vector<1x1x128xf32>,
    } else {
    }
    return
  }
  func.func @transform_0(%arg0: i32, %arg1: i32) -> (i32, i32) {
    %c0_i32 = arith.constant 0 : i32
    return %arg0, %arg1 : i32, i32
  }
  func.func @transform_1(%arg0: i32, %arg1: i32) -> (i32, i32) {
    %c0_i32 = arith.constant 0 : i32
    %c0_i32_0 = arith.constant 0 : i32
    return %arg0, %c0_i32 : i32, i32
  }
  func.func @transform_2(%arg0: i32, %arg1: i32) -> (i32, i32, i32) {
    %c0_i32 = arith.constant 0 : i32
    %c0_i32_0 = arith.constant 0 : i32
    %c0_i32_1 = arith.constant 0 : i32
    %c0_i32_2 = arith.constant 0 : i32
    return %c0_i32, %c0_i32_0, %c0_i32_1 : i32, i32, i32
  }
  func.func @transform_3(%arg0: i32, %arg1: i32) -> (i32, i32, i32) {
    %c0_i32 = arith.constant 0 : i32
    %c0_i32_0 = arith.constant 0 : i32
    %c0_i32_1 = arith.constant 0 : i32
    %c0_i32_2 = arith.constant 0 : i32
    return %c0_i32, %c0_i32_0, %c0_i32_1 : i32, i32, i32
  }
  func.func @transform_4(%arg0: i32, %arg1: i32) -> (i32, i32) {
    %c0_i32 = arith.constant 0 : i32
    return %arg0, %arg1 : i32, i32
  }
  func.func @transform_5(%arg0: i32, %arg1: i32) -> (i32, i32, i32) {
    %c0_i32 = arith.constant 0 : i32
    %c0_i32_0 = arith.constant 0 : i32
    %c0_i32_1 = arith.constant 0 : i32
    return %arg0, %c0_i32, %c0_i32_0 : i32, i32, i32
  }
}

</mosaic_0001>

<bundles_post_ra>
// kernel: tpu_custom_call.1
= control target key start
LH: loop header
LB: loop body
LE: loop exit
PB: predicated region body
PF: predicated region fallthrough
CT: control target
= control target key end

     0   :  { %11 = vsyncpa [#allocation5], 0  ;;  %s288_s0 = inlined_call_operand.hbm [shape: f32[8,256], index: 0, kind: input, shape index: {}]   ;;  %s289_s1 = inlined_call_operand.vmem [shape: f32[8,4], index: 1, kind: input, shape index: {}]   ;;  %s290_s2 = inlined_call_operand.vmem [shape: f32[1,1,256], index: 2, kind: input, shape index: {}]   ;;  %s291_s3 = inlined_call_operand.vmem [shape: f32[1,1,256], index: 3, kind: input, shape index: {}]   ;;  %s292_s4 = inlined_call_operand.hbm [shape: f32[8,256], index: 4, kind: output, shape index: {0}]   ;;  %s293_s5 = inlined_call_operand.hbm [shape: f32[1,1,128], index: 5, kind: output, shape index: {1}]  }
   0x1   :  { %12 = vsyncpa [#allocation6], 0 }
   0x2   :  { %13 = vsyncpa [#allocation9], 0  ;;  %s19_s20 = sshll.u32 %s288_s0, 4  ;;  %s236_s21 = smov [#allocation4]   ;;  %s20_s20 = int_to_ptr.hbm [resolvable:$true] %s19_s20 }
   0x3   :  { %s21_s22 = sshll.u32 %s236_s21, 4  ;;  %s22_s22 = int_to_ptr.vmem [resolvable:$true] %s21_s22 }
   0x4   :  { %24 = dma.hbm_to_vmem [thread:$0]  %s20_s20, 256, %s22_s22, [#allocation5]  }
   0x5   :  { %230 = dma.done.wait [#allocation5], 256  }
   0x6   :  { %231 = vsyncadd [#allocation5], 4294967040  ;;  %v39_v0 = vld [vmem:[%s289_s1] sm:$0xff]  ;;  %vm41_vm0 = vcmask 31744   ;;  %v237_v3 = vmov 0   ;;  %vm48_vm1 = vcmask 7168   ;;  %v110_v36 = vlaneseq }
   0x7   :  { %v40_v1 = vmul.f32 %v39_v0, %v39_v0  ;;  %155 = vset.pattern.permute.xlu0 %v237_v3  ;;  %v56_v9 = vld [vmem:[%s291_s3] sm:$0x3]  ;;  %v72_v10 = vld [vmem:[#allocation4] sm:$0xff]  ;;  %v73_v11 = vld [vmem:[#allocation4 + $0x8] sm:$0xff]  ;;  %s123_s29 = sshll.u32 %s292_s4, 4  ;;  %s239_s30 = smov [#allocation8]   ;;  %s124_s29 = int_to_ptr.hbm [resolvable:$true] %s123_s29 }
   0x8   :  { %v54_v12 = vld [vmem:[%s290_s2] sm:$0x3]  ;;  %v74_v13 = vmul.f32 1.5707964, %v72_v10  ;;  %v75_v14 = vmul.f32 1.5707964, %v73_v11 }
   0x9   :  { %v42_v2 = vsel %vm41_vm0, %v40_v1, 0.0  ;;  %v77_v15 = vperm.slane %v56_v9, 0  ;;  %v78_v16 = vperm.slane %v56_v9, 1  ;;  %v64_v17 = vperm.slane %v54_v12, 0  ;;  %s238_s2 = smov [#allocation7]   ;;  %s132_s6 = sshll.u32 %s239_s30, 4  ;;  %s133_s6 = int_to_ptr.vmem [resolvable:$true] %s132_s6 }
   0xa   :  { %43 = vadd.xlane.f32.xlu0 %v42_v2  ;;  %v65_v18 = vperm.slane %v54_v12, 1  ;;  %s121_s3 = sshll.u32 %s238_s2, 4  ;;  %v111_v37 = vand.u32 127, %v110_v36  ;;  %s134_s9 = sshll.u32 %s293_s5, 4  ;;  %s122_s3 = int_to_ptr.vmem [resolvable:$true] %s121_s3  ;;  %s135_s9 = int_to_ptr.hbm [resolvable:$true] %s134_s9 }
   0xb   :  { %v81_v19 = vadd.f32 %v77_v15, %v74_v13  ;;  %v82_v20 = vadd.f32 %v78_v16, %v75_v14 }
   0xc   :  { %vm112_vm2 = vcmp.eq.s32.totalorder %v111_v37, 0 }
  0x7d   :  { %v44_v4 = vpop.xlane.xlu0 %43 }
  0x7e   :  { %v45_v5 = vmul.f32 -0.5, %v44_v4 }
  0x80   :  { %v46_v6 = vmul.f32 1.442695, %v45_v5 }
  0x82   :  { %156 = vpow2.f32 %v46_v6 }
  0x88   :  { %v157_v7 = vpop.eup %156 }
  0x89   :  { %49 = vst.msk [vmem:[#allocation2] sm:$0xff] %vm48_vm1, %v157_v7 }
  0x90   :  { %v57_v8 = vld [vmem:[#allocation2] sm:$0xff] }
  0x91   :  { %60 = vperm.xlu0 %155, %v57_v8  }
 0x103   :  { %v61_v21 = vpop.permute.xlu0 %60 }
 0x104   :  { %v68_v22 = vmul.f32 %v64_v17, %v61_v21  ;;  %v69_v23 = vmul.f32 %v65_v18, %v61_v21 }
 0x106   :  { %70 = vst [vmem:[#allocation7] sm:$0xff] %v68_v22  ;;  %v83_v24 = vsub.f32 %v81_v19, %v68_v22  ;;  %v84_v25 = vsub.f32 %v82_v20, %v69_v23 }
 0x107   :  { %71 = vst [vmem:[#allocation7 + $0x8] sm:$0xff] %v69_v23 }
 0x108   :  { %v85_v26 = vmul.f32 %v83_v24, %v83_v24  ;;  %v86_v27 = vmul.f32 %v84_v25, %v84_v25  ;;  %126 = dma.vmem_to_hbm [thread:$0]  %s122_s3, 256, %s124_s29, [#allocation6]  }
 0x10a   :  { %v100_v28 = vadd.f32 %v86_v27, %v85_v26 }
 0x10c   :  { %101 = vadd.xlane.f32.xlu1 %v100_v28 }
 0x17f   :  { %v102_v29 = vpop.xlane.xlu1 %101 }
 0x180   :  { %v103_v30 = vrot.slane %v102_v29, 4 }
 0x182   :  { %v104_v31 = vadd.f32 %v103_v30, %v102_v29 }
 0x184   :  { %v105_v32 = vrot.slane %v104_v31, 2 }
 0x186   :  { %v106_v33 = vadd.f32 %v105_v32, %v104_v31 }
 0x188   :  { %v107_v34 = vrot.slane %v106_v33, 1 }
 0x18a   :  { %v108_v35 = vadd.f32 %v107_v34, %v106_v33 }
 0x18c   :  { %149 = vpush %v108_v35 }
 0x1bd   :  { %s150_s4 = spop %149 }
 0x1be   :  { %v113_v38 = vstv %s150_s4 }
 0x1bf   :  { %v114_v39 = vsel %vm112_vm2, %v113_v38, 0.0 }
 0x1c0   :  { %115 = vst [vmem:[#allocation8] sm:$0x1] %v114_v39 }
 0x1c1   :  { %137 = dma.vmem_to_hbm [thread:$0]  %s133_s6, 16, %s135_s9, [#allocation9]  }
 0x1c2   :  { %232 = dma.done.wait [#allocation6], 256  }
 0x1c3   :  { %233 = vsyncadd [#allocation6], 4294967040 }
 0x1c4   :  { %234 = dma.done.wait [#allocation9], 16  }
 0x1c5   :  { %235 = vsyncadd [#allocation9], 4294967280 }
 0x1c6   :  { %146 = vsyncpa [#allocation5], 1 }
 0x1c7   :  { %147 = vsyncpa [#allocation6], 1 }
 0x1c8   :  { %148 = vsyncpa [#allocation9], 1 }

</bundles_post_ra>
